<compile_context>
chip_gen: v5e
topology: v5e:2x2
jax: 0.10.0
libtpu: 0.0.40
codegen_flags: <defaults>
</compile_context>

<pallas_src>
import jax
import jax.numpy as jnp
from jax.experimental import pallas as pl
from jax.experimental.pallas import tpu as pltpu


_SMALL_C_MAX = 16   # unroll the channel loop into static lane slices up to this many channels


def _round_up(v, m):
    return ((v + m - 1) // m) * m


def _tpu_generation():
    """Return (scoped vmem_limit_bytes, TensorCores per chip) sized per TPU generation."""
    kind = ""
    try:
        kind = jax.devices()[0].device_kind.lower()
    except Exception:
        pass
    if "v5" in kind or "v6" in kind:
        # v5e / v6e: 128 MiB physical VMEM, single TensorCore per chip.
        return 96 * 1024 * 1024, 1
    # v7x (64 MiB VMEM per TensorCore, 2 TCs per chip) or unknown generation: stay conservative.
    return 48 * 1024 * 1024, 2


def _plan_blocks(batch, channels, timesteps, itemsize, small_c):
    """Pick the batch-block size BB (from the VMEM budget only) and the scoped-VMEM limit."""
    limit, ncores = _tpu_generation()
    slack = 6 * 1024 * 1024        # weights, output blocks, semaphores, compiler scratch
    lanes_t = _round_up(timesteps, 128)
    if small_c:
        # Dense (BB, C*T) input block, double-buffered, + ~4 live f32 (BB, T) intermediates.
        per_row = 2 * _round_up(channels * timesteps, 128) * itemsize + 4 * lanes_t * 4
    else:
        # (BB, C->8k, T) input block, double-buffered, + one full-rank f32 product + (BB,T) temps.
        c_pad = _round_up(channels, 8)
        per_row = 2 * c_pad * lanes_t * itemsize + c_pad * lanes_t * 4 + 3 * lanes_t * 4
    bb = (limit - slack) // per_row
    bb = max(8, (bb // 8) * 8)
    if ncores == 2 and batch >= 16:
        # v7x megacore: keep >= 2 pipelined grid steps per TensorCore when the batch allows it.
        bb = min(bb, max(8, _round_up(-(-batch // (2 * ncores)), 8)))
    bb = min(bb, batch)
    # Make sure the requested limit covers at least one double-buffered block at the BB floor.
    limit = max(limit, bb * per_row + slack)
    return bb, int(limit)


def _make_small_c_kernel(channels, timesteps, block_b, batch):
    """x presented as a (BB, C*T) slab; the channel loop is unrolled into static lane slices."""
    need_mask = (batch % block_b) != 0

    def kernel(w_ref, x_ref, o_ref):
        # w_ref: (C,) f32 in SMEM.   x_ref: (BB, C*T) block.   o_ref: (BB, C) block.
        def chan(c):
            # Dense (BB, T) lane-range slice of channel c, upcast so accumulation is f32.
            return x_ref[:, c * timesteps:(c + 1) * timesteps].astype(jnp.float32)

        # 1x1 Conv1d over channels: f32 accumulate over dense (BB, T) slabs (VPU only).
        scores = chan(0) * w_ref[0]
        for c in range(1, channels):
            scores = scores + chan(c) * w_ref[c]
        # Conv bias dropped: softmax over T is shift-invariant, so it cancels exactly.

        if need_mask:
            # Tail block of a non-divisible batch: keep the garbage rows finite; Pallas drops
            # their out-of-bounds writes, and every row's math is independent.
            row = (pl.program_id(0) * block_b
                   + jax.lax.broadcasted_iota(jnp.int32, (block_b, 1), 0))
            scores = jnp.where(row < batch, scores, 0.0)

        # Numerically-stable softmax numerator; normalization deferred to one reciprocal/row.
        m = jnp.max(scores, axis=-1, keepdims=True)               # (BB, 1)
        e = jnp.exp(scores - m)                                   # (BB, T)
        inv = pl.reciprocal(jnp.sum(e, axis=-1, keepdims=True), approx=False)

        # Weighted pooling over T: per channel, one VPU multiply + lane reduce on dense slabs.
        cols = [jnp.sum(chan(c) * e, axis=-1, keepdims=True) for c in range(channels)]
        pooled = jnp.concatenate(cols, axis=-1)                   # (BB, C)
        o_ref[...] = (pooled * inv).astype(o_ref.dtype)

    return kernel


def _make_big_c_kernel(channels, timesteps, block_b, batch):
    """Fallback for large C: full-rank (BB, C, T) blocks (sublane padding waste is <= 8/C)."""
    need_mask = (batch % block_b) != 0

    def kernel(w_ref, x_ref, o_ref):
        # w_ref: (C, 1) f32 in VMEM.   x_ref: (BB, C, T).   o_ref: (BB, C).
        x = x_ref[...]
        # f32 promotion happens inside the elementwise product, so the channel reduce
        # accumulates in f32 even for bf16 inputs.
        scores = jnp.sum(x * w_ref[...], axis=1)                  # (BB, T) f32
        if need_mask:
            row = (pl.program_id(0) * block_b
                   + jax.lax.broadcasted_iota(jnp.int32, (block_b, 1), 0))
            scores = jnp.where(row < batch, scores, 0.0)
        m = jnp.max(scores, axis=-1, keepdims=True)
        e = jnp.exp(scores - m)
        inv = pl.reciprocal(jnp.sum(e, axis=-1, keepdims=True), approx=False)
        pooled = jnp.sum(x * e[:, None, :], axis=-1)              # (BB, C) f32
        o_ref[...] = (pooled * inv).astype(o_ref.dtype)

    return kernel


def attention_pooling(x, w, bias=None, *, block_b=None):
    """Pallas port of AttentionPooling.forward.

    x: (B, C, T).  w: Conv1d(C, 1, 1) weight (any shape with C elements).  bias: conv bias,
    accepted for API parity but mathematically a no-op under the softmax (shift invariance).
    Returns (B, C) in x.dtype.  `block_b` optionally overrides the batch-block size.
    """
    del bias  # cancels exactly inside softmax
    B, C, T = x.shape
    w_flat = jnp.asarray(w, jnp.float32).reshape(C)
    small_c = C <= _SMALL_C_MAX

    bb, vmem_limit = _plan_blocks(B, C, T, x.dtype.itemsize, small_c)
    if block_b is not None:
        bb = min(int(block_b), B)
    n_blk = -(-B // bb)   # cdiv; partial tail block handled by OOB masking + in-kernel row mask

    if small_c:
        kernel = _make_small_c_kernel(C, T, bb, B)
        x_in = x.reshape(B, C * T)        # free: contiguous view of the NCW layout
        w_arg = w_flat                    # (C,) scalars in SMEM
        in_specs = [
            pl.BlockSpec(memory_space=pltpu.MemorySpace.SMEM),
            pl.BlockSpec((bb, C * T), lambda i: (i, 0)),
        ]
    else:
        kernel = _make_big_c_kernel(C, T, bb, B)
        x_in = x
        w_arg = w_flat.reshape(C, 1)      # resident VMEM weight column
        in_specs = [
            pl.BlockSpec((C, 1), lambda i: (0, 0)),
            pl.BlockSpec((bb, C, T), lambda i: (i, 0, 0)),
        ]

    return pl.pallas_call(
        kernel,
        out_shape=jax.ShapeDtypeStruct((B, C), x.dtype),
        grid_spec=pltpu.PrefetchScalarGridSpec(
            num_scalar_prefetch=0,
            grid=(n_blk,),
            in_specs=in_specs,
            out_specs=pl.BlockSpec((bb, C), lambda i: (i, 0)),
        ),
        compiler_params=pltpu.CompilerParams(
            dimension_semantics=("parallel",),     # batch blocks are independent (v7x: 2 TCs)
            vmem_limit_bytes=vmem_limit,
        ),
    )(w_arg, x_in)


def reference(x, w, bias):
    # Full-precision f32 reference of the PyTorch module (bias included).
    scores = jnp.einsum("oc,bct->bot", w.reshape(1, -1), x,
                        precision=jax.lax.Precision.HIGHEST) + bias[None, :, None]   # (B, 1, T)
    p = jax.nn.softmax(scores, axis=-1)
    return jnp.sum(p * x, axis=-1)                                                   # (B, C)


if __name__ == "__main__":
    key = jax.random.PRNGKey(0)
    kx, kw, kb, kx2 = jax.random.split(key, 4)

    # Primary shapes implied by the module: small batch, C IMU channels, T timesteps.
    B, C, T = 2, 4, 16
    x = jax.random.normal(kx, (B, C, T), dtype=jnp.float32)
    bound = 1.0 / jnp.sqrt(C)
    w = jax.random.uniform(kw, (1, C), jnp.float32, minval=-bound, maxval=bound)
    bias = jax.random.uniform(kb, (1,), jnp.float32, minval=-bound, maxval=bound)

    out = attention_pooling(x, w, bias)
    jax.block_until_ready(out)
    ref = reference(x, w, bias)
    assert out.shape == (B, C), out.shape
    assert jnp.allclose(out, ref, atol=1e-5, rtol=1e-5), (out, ref)

    # Exercise the multi-block grid and the non-divisible tail block (no wrapper padding).
    B2, T2 = 20, 128
    x2 = jax.random.normal(kx2, (B2, C, T2), dtype=jnp.float32)
    out2 = attention_pooling(x2, w, bias, block_b=8)     # 3 blocks, last one partial
    jax.block_until_ready(out2)
    ref2 = reference(x2, w, bias)
    assert out2.shape == (B2, C), out2.shape
    assert jnp.allclose(out2, ref2, atol=1e-5, rtol=1e-5), (out2, ref2)

    print("KERNEL_OK")
</pallas_src>

<mosaic_0001>
module attributes {stable_mosaic.version = 11 : i64} {
  func.func @kernel(%arg0: i32, %arg1: memref<4xf32, #tpu.memory_space<smem>>, %arg2: memref<2x64xf32, #tpu.memory_space<vmem>>, %arg3: memref<2x4xf32, #tpu.memory_space<vmem>>) attributes {dimension_semantics = [#tpu.dimension_semantics<parallel>], iteration_bounds = array<i64: 1>, scalar_prefetch = 0 : i64, scratch_operands = 0 : i64, tpu.core_type = #tpu.core_type<tc>, window_params = [{transform_indices = @transform_0, window_bounds = array<i64: 4>}, {transform_indices = @transform_1, window_bounds = array<i64: 2, 64>}, {transform_indices = @transform_2, window_bounds = array<i64: 2, 4>}]} {
    %c0 = arith.constant 0 : index
    %c0_0 = arith.constant 0 : index
    %0 = vector.load %arg2[%c0, %c0_0] : memref<2x64xf32, #tpu.memory_space<vmem>>, vector<2x16xf32>
    %c0_1 = arith.constant 0 : index
    %1 = memref.load %arg1[%c0_1] : memref<4xf32, #tpu.memory_space<smem>>
    %2 = vector.broadcast %1 : f32 to vector<2x16xf32>
    %3 = arith.mulf %0, %2 : vector<2x16xf32>
    %c0_2 = arith.constant 0 : index
    %c16 = arith.constant 16 : index
    %4 = vector.load %arg2[%c0_2, %c16] : memref<2x64xf32, #tpu.memory_space<vmem>>, vector<2x16xf32>
    %c1 = arith.constant 1 : index
    %5 = memref.load %arg1[%c1] : memref<4xf32, #tpu.memory_space<smem>>
    %6 = vector.broadcast %5 : f32 to vector<2x16xf32>
    %7 = arith.mulf %4, %6 : vector<2x16xf32>
    %8 = arith.addf %3, %7 : vector<2x16xf32>
    %c0_3 = arith.constant 0 : index
    %c32 = arith.constant 32 : index
    %9 = vector.load %arg2[%c0_3, %c32] : memref<2x64xf32, #tpu.memory_space<vmem>>, vector<2x16xf32>
    %c2 = arith.constant 2 : index
    %10 = memref.load %arg1[%c2] : memref<4xf32, #tpu.memory_space<smem>>
    %11 = vector.broadcast %10 : f32 to vector<2x16xf32>
    %12 = arith.mulf %9, %11 : vector<2x16xf32>
    %13 = arith.addf %8, %12 : vector<2x16xf32>
    %c0_4 = arith.constant 0 : index
    %c48 = arith.constant 48 : index
    %14 = vector.load %arg2[%c0_4, %c48] : memref<2x64xf32, #tpu.memory_space<vmem>>, vector<2x16xf32>
    %c3 = arith.constant 3 : index
    %15 = memref.load %arg1[%c3] : memref<4xf32, #tpu.memory_space<smem>>
    %16 = vector.broadcast %15 : f32 to vector<2x16xf32>
    %17 = arith.mulf %14, %16 : vector<2x16xf32>
    %18 = arith.addf %13, %17 : vector<2x16xf32>
    %cst = arith.constant dense<0xFF800000> : vector<2xf32>
    %19 = vector.multi_reduction <maximumf>, %18, %cst [1] : vector<2x16xf32> to vector<2xf32>
    %20 = vector.shape_cast %19 : vector<2xf32> to vector<2x1xf32>
    %21 = vector.broadcast %20 : vector<2x1xf32> to vector<2x16xf32>
    %22 = arith.subf %18, %21 : vector<2x16xf32>
    %23 = math.exp %22 : vector<2x16xf32>
    %cst_5 = arith.constant dense<0.000000e+00> : vector<2xf32>
    %24 = vector.multi_reduction <add>, %23, %cst_5 [1] : vector<2x16xf32> to vector<2xf32>
    %25 = vector.shape_cast %24 : vector<2xf32> to vector<2x1xf32>
    %26 = tpu.reciprocal %25 : vector<2x1xf32> -> vector<2x1xf32>
    %c0_6 = arith.constant 0 : index
    %c0_7 = arith.constant 0 : index
    %27 = vector.load %arg2[%c0_6, %c0_7] : memref<2x64xf32, #tpu.memory_space<vmem>>, vector<2x16xf32>
    %28 = arith.mulf %27, %23 : vector<2x16xf32>
    %cst_8 = arith.constant dense<0.000000e+00> : vector<2xf32>
    %29 = vector.multi_reduction <add>, %28, %cst_8 [1] : vector<2x16xf32> to vector<2xf32>
    %30 = vector.shape_cast %29 : vector<2xf32> to vector<2x1xf32>
    %c0_9 = arith.constant 0 : index
    %c16_10 = arith.constant 16 : index
    %31 = vector.load %arg2[%c0_9, %c16_10] : memref<2x64xf32, #tpu.memory_space<vmem>>, vector<2x16xf32>
    %32 = arith.mulf %31, %23 : vector<2x16xf32>
    %cst_11 = arith.constant dense<0.000000e+00> : vector<2xf32>
    %33 = vector.multi_reduction <add>, %32, %cst_11 [1] : vector<2x16xf32> to vector<2xf32>
    %34 = vector.shape_cast %33 : vector<2xf32> to vector<2x1xf32>
    %c0_12 = arith.constant 0 : index
    %c32_13 = arith.constant 32 : index
    %35 = vector.load %arg2[%c0_12, %c32_13] : memref<2x64xf32, #tpu.memory_space<vmem>>, vector<2x16xf32>
    %36 = arith.mulf %35, %23 : vector<2x16xf32>
    %cst_14 = arith.constant dense<0.000000e+00> : vector<2xf32>
    %37 = vector.multi_reduction <add>, %36, %cst_14 [1] : vector<2x16xf32> to vector<2xf32>
    %38 = vector.shape_cast %37 : vector<2xf32> to vector<2x1xf32>
    %c0_15 = arith.constant 0 : index
    %c48_16 = arith.constant 48 : index
    %39 = vector.load %arg2[%c0_15, %c48_16] : memref<2x64xf32, #tpu.memory_space<vmem>>, vector<2x16xf32>
    %40 = arith.mulf %39, %23 : vector<2x16xf32>
    %cst_17 = arith.constant dense<0.000000e+00> : vector<2xf32>
    %41 = vector.multi_reduction <add>, %40, %cst_17 [1] : vector<2x16xf32> to vector<2xf32>
    %42 = vector.shape_cast %41 : vector<2xf32> to vector<2x1xf32>
    %43 = tpu.concatenate %30, %34, %38, %42 in 1 : vector<2x1xf32>, vector<2x1xf32>, vector<2x1xf32>, vector<2x1xf32> -> vector<2x4xf32>
    %44 = vector.broadcast %26 : vector<2x1xf32> to vector<2x4xf32>
    %45 = arith.mulf %43, %44 : vector<2x4xf32>
    %c0_18 = arith.constant 0 : index
    %c0_19 = arith.constant 0 : index
    %46 = vector.load %arg3[%c0_18, %c0_19] : memref<2x4xf32, #tpu.memory_space<vmem>>, vector<2x4xf32>
    tpu.vector_store %arg3[%c0_18, %c0_19], %45 {strides = array<i32>} : memref<2x4xf32, #tpu.memory_space<vmem>>, vector<2x4xf32>,
    return
  }
  func.func @transform_0(%arg0: i32) -> i32 {
    %c0_i32 = arith.constant 0 : i32
    %c0_i32_0 = arith.constant 0 : i32
    return %c0_i32 : i32
  }
  func.func @transform_1(%arg0: i32) -> (i32, i32) {
    %c0_i32 = arith.constant 0 : i32
    %c0_i32_0 = arith.constant 0 : i32
    return %arg0, %c0_i32 : i32, i32
  }
  func.func @transform_2(%arg0: i32) -> (i32, i32) {
    %c0_i32 = arith.constant 0 : i32
    %c0_i32_0 = arith.constant 0 : i32
    return %arg0, %c0_i32 : i32, i32
  }
}

</mosaic_0001>

<bundles_post_ra>
// kernel: tpu_custom_call.1
= control target key start
LH: loop header
LB: loop body
LE: loop exit
PB: predicated region body
PF: predicated region fallthrough
CT: control target
= control target key end

     0   :  { %7 = vsyncpa [#allocation5], 0  ;;  %s281_s0 = inlined_call_operand.hbm [shape: f32[4], index: 0, kind: input, shape index: {}]   ;;  %s282_s1 = inlined_call_operand.hbm [shape: f32[2,64], index: 1, kind: input, shape index: {}]   ;;  %s283_s2 = inlined_call_operand.hbm [shape: f32[2,4], index: 2, kind: output, shape index: {}]  }
   0x1   :  { %8 = vsyncpa [#allocation3], 0 }
   0x2   :  { %9 = vsyncpa [#allocation4], 0  ;;  %s15_s11 = sshll.u32 %s281_s0, 4  ;;  %s24_s14 = sshll.u32 %s282_s1, 4  ;;  %s16_s11 = int_to_ptr.hbm [resolvable:$true] %s15_s11  ;;  %s25_s14 = int_to_ptr.hbm [resolvable:$true] %s24_s14 }
   0x3   :  { %s238_s15 = smov [#allocation2]   ;;  %s239_s16 = smov [#allocation6]  }
   0x4   :  { %18 = dma.hbm_to_smem %s16_s11, 16, %s238_s15, [#allocation5]  }
   0x5   :  { %s26_s17 = sshll.u32 %s239_s16, 4  ;;  %s27_s17 = int_to_ptr.vmem [resolvable:$true] %s26_s17 }
   0x6   :  { %29 = dma.hbm_to_vmem [thread:$0]  %s25_s14, 32, %s27_s17, [#allocation3]  }
   0x7   :  { %232 = dma.done.wait [#allocation5], 16  }
   0x8   :  { %233 = vsyncadd [#allocation5], 4294967280 }
   0x9   :  { %234 = dma.done.wait [#allocation3], 32  }
   0xa   :  { %235 = vsyncadd [#allocation3], 4294967264 }
   0xb   :  { %38 = sfence }
   0xc   :  { %s156_s18 = sld [smem:[#allocation2 + $0x1]]  ;;  %v39_v0 = vld [vmem:[#allocation6] sm:$0x3]  ;;  %s240_s1 = smov 112   ;;  %vm67_vm0 = vcmask 123904   ;;  %vm129_vm3 = vcmask 7168  }
   0xd   :  { %s157_s19 = sld [smem:[#allocation2 + $0x2]]  ;;  %s241_s20 = smov 80   ;;  %vm131_vm5 = vcmask 15360   ;;  %vm133_vm6 = vcmask 23552   ;;  %vm136_vm8 = vcmask 25600  }
   0xe   :  { %s158_s0 = sld [smem:[#allocation2 + $0x3]]  ;;  %s242_s21 = smov 96  }
   0xf   :  { %s40_s22 = sld [smem:[#allocation2]]  ;;  %s243_s23 = smov 48  }
  0x10   :  { %s244_s24 = smov 16   ;;  %s245_s25 = smov 32  }
  0x11   :  { %s246_s26 = smov [#allocation7]   ;;  %s145_s30 = sshll.u32 %s283_s2, 4  ;;  %s146_s30 = int_to_ptr.hbm [resolvable:$true] %s145_s30 }
  0x12   :  { %v44_v1 = vstv %s156_s18  ;;  %s143_s27 = sshll.u32 %s246_s26, 4  ;;  %s144_s27 = int_to_ptr.vmem [resolvable:$true] %s143_s27 }
  0x13   :  { %v45_v2 = vmul.f32 %v44_v1, %v39_v0  ;;  %v52_v5 = vstv %s157_s19 }
  0x14   :  { %v60_v3 = vstv %s158_s0  ;;  %v53_v6 = vmul.f32 %v52_v5, %v39_v0 }
  0x15   :  { %47 = vrot.lane.b32.xlu0 %v45_v2, %s240_s1  ;;  %v61_v4 = vmul.f32 %v60_v3, %v39_v0  ;;  %v41_v7 = vstv %s40_s22 }
  0x16   :  { %v42_v9 = vmul.f32 %v41_v7, %v39_v0 }
  0x17   :  { %63 = vrot.lane.b32.xlu1 %v61_v4, %s241_s20 }
  0x1d   :  { %55 = vrot.lane.b32.xlu0 %v53_v6, %s242_s21 }
  0x87   :  { %v48_v8 = vpop.permute.xlu0 %47 }
  0x88   :  { %v50_v10 = vadd.f32 %v48_v8, %v42_v9 }
  0x89   :  { %v64_v12 = vpop.permute.xlu1 %63 }
  0x8f   :  { %v56_v11 = vpop.permute.xlu0 %55 }
  0x90   :  { %v58_v13 = vadd.f32 %v56_v11, %v50_v10 }
  0x92   :  { %v66_v14 = vadd.f32 %v64_v12, %v58_v13 }
  0x94   :  { %v68_v15 = vsel %vm67_vm0, %v66_v14, -inf }
  0x95   :  { %69 = vmax.xlane.f32.xlu1 %v68_v15 }
 0x108   :  { %v70_v16 = vpop.xlane.xlu1 %69 }
 0x109   :  { %v71_v17 = vsub.f32 %v66_v14, %v70_v16 }
 0x10b   :  { %v72_v18 = vmul.f32 1.442695, %v71_v17 }
 0x10d   :  { %168 = vpow2.f32 %v72_v18 }
 0x113   :  { %v169_v19 = vpop.eup %168 }
 0x114   :  { %118 = vrot.lane.b32.xlu0 %v169_v19, %s243_s23  ;;  %96 = vrot.lane.b32.xlu2 %v169_v19, %s244_s24  ;;  %v74_v26 = vsel %vm67_vm0, %v169_v19, 0.0  ;;  %v91_v27 = vmul.f32 %v169_v19, %v39_v0 }
 0x116   :  { %v92_v28 = vsel %vm67_vm0, %v91_v27, 0.0 }
 0x11c   :  { %107 = vrot.lane.b32.xlu2 %v169_v19, %s245_s25 }
 0x16e   :  { %v97_v20 = vpop.permute.xlu2 %96 }
 0x16f   :  { %v99_v21 = vmul.f32 %v97_v20, %v39_v0 }
 0x171   :  { %101 = vrot.lane.b32.xlu2 %v99_v21, %s240_s1 }
 0x176   :  { %v108_v22 = vpop.permute.xlu2 %107 }
 0x177   :  { %v110_v23 = vmul.f32 %v108_v22, %v39_v0 }
 0x179   :  { %112 = vrot.lane.b32.xlu0 %v110_v23, %s242_s21 }
 0x186   :  { %v119_v24 = vpop.permute.xlu0 %118 }
 0x187   :  { %v121_v25 = vmul.f32 %v119_v24, %v39_v0 }
 0x189   :  { %123 = vrot.lane.b32.xlu2 %v121_v25, %s241_s20 }
 0x1a3   :  { %75 = vadd.xlane.f32.xlu0 %v74_v26 }
 0x1b2   :  { %93 = vadd.xlane.f32.xlu2 %v92_v28 }
 0x1cb   :  { %v102_v29 = vpop.permute.xlu2 %101 }
 0x1cc   :  { %v104_v30 = vsel %vm67_vm0, %v102_v29, 0.0 }
 0x1cd   :  { %105 = vadd.xlane.f32.xlu1 %v104_v30 }
 0x1e3   :  { %v124_v33 = vpop.permute.xlu2 %123 }
 0x1e4   :  { %v126_v34 = vsel %vm67_vm0, %v124_v33, 0.0 }
 0x1eb   :  { %v113_v31 = vpop.permute.xlu0 %112 }
 0x1ec   :  { %v115_v32 = vsel %vm67_vm0, %v113_v31, 0.0 }
 0x1ed   :  { %116 = vadd.xlane.f32.xlu1 %v115_v32 }
 0x1f5   :  { %127 = vadd.xlane.f32.xlu1 %v126_v34 }
 0x216   :  { %v76_v35 = vpop.xlane.xlu0 %75 }
 0x217   :  { %170 = vrcp.f32 %v76_v35  ;;  %v88_v43 = vand.u32 2147483648, %v76_v35  ;;  %vm82_vm2 = vweird.f32 %v76_v35  ;;  %v86_v44 = vand.u32 2147483647, %v76_v35 }
 0x219   :  { %v89_v47 = vor.u32 1.1754944e-38, %v88_v43  ;;  %vm87_vm7 = vcmp.eq.f32.partialorder %v86_v44, 8.507059e+37 }
 0x21d   :  { %v171_v36 = vpop.eup %170 }
 0x21e   :  { %v78_v37 = vmul.f32 %v171_v36, %v76_v35  ;;  %vm83_vm1 = vweird.f32 %v171_v36 }
 0x21f   :  { %vm84_vm4 = vmor %vm82_vm2, %vm83_vm1 }
 0x220   :  { %v79_v39 = vsub.f32 1.0, %v78_v37 }
 0x222   :  { %v80_v40 = vmul.f32 %v171_v36, %v79_v39 }
 0x224   :  { %v81_v42 = vadd.f32 %v171_v36, %v80_v40 }
 0x225   :  { %v94_v45 = vpop.xlane.xlu2 %93 }
 0x226   :  { %v85_v46 = vsel %vm84_vm4, %v171_v36, %v81_v42 }
 0x227   :  { %v90_v51 = vsel %vm87_vm7, %v89_v47, %v85_v46 }
 0x240   :  { %v106_v38 = vpop.xlane.xlu1 %105 }
 0x241   :  { %v130_v48 = vsel %vm129_vm3, %v94_v45, %v106_v38 }
 0x260   :  { %v117_v41 = vpop.xlane.xlu1 %116 }
 0x261   :  { %v132_v49 = vsel %vm131_vm5, %v130_v48, %v117_v41 }
 0x268   :  { %v128_v50 = vpop.xlane.xlu1 %127 }
 0x269   :  { %v134_v52 = vsel %vm133_vm6, %v132_v49, %v128_v50 }
 0x26a   :  { %v135_v53 = vmul.f32 %v134_v52, %v90_v51 }
 0x26c   :  { %137 = vst.msk [vmem:[#allocation7] sm:$0x3] %vm136_vm8, %v135_v53 }
 0x26d   :  { %148 = dma.vmem_to_hbm [thread:$0]  %s144_s27, 32, %s146_s30, [#allocation4]  }
 0x26e   :  { %236 = dma.done.wait [#allocation4], 32  }
 0x26f   :  { %237 = vsyncadd [#allocation4], 4294967264 }
 0x270   :  { %153 = vsyncpa [#allocation3], 1 }
 0x271   :  { %154 = vsyncpa [#allocation4], 1 }
 0x272   :  { %155 = vsyncpa [#allocation5], 1 }

</bundles_post_ra>
